<compile_context>
chip_gen: v6e
topology: v6e:2x2x1
jax: 0.10.0
libtpu: 0.0.40
codegen_flags: <defaults>
</compile_context>

<pallas_src>
import functools
import math

import jax
import jax.numpy as jnp
from jax.experimental import pallas as pl
from jax.experimental.pallas import tpu as pltpu


def _round_up(x, m):
    return (x + m - 1) // m * m


# ----------------------------------------------------------------------------
# Pallas kernel: (block_m, K) @ (K, 128) matmul + fused bias, narrow store.
# ----------------------------------------------------------------------------
def _linear_kernel(z_ref, w_ref, b_ref, o_ref):
    acc = jnp.dot(z_ref[...], w_ref[...], preferred_element_type=jnp.float32)
    acc = acc + b_ref[...]
    # Lane-slice down to num_classes; store is masked (vst.msk) but the
    # HBM-byte savings dominate for this mem-bound kernel.
    o_ref[...] = acc[:, : o_ref.shape[-1]].astype(o_ref.dtype)


def linear_forward(z, w_t_padded, bias_padded, num_classes, tm=512):
    """out = z @ W.T + b.

    z:            (M, K)  activations, f32 (NOT padded by the wrapper)
    w_t_padded:   (K, Np) weight, already transposed + lane-padded at init
    bias_padded:  (1, Np) bias, already lane-padded at init
    returns:      (M, num_classes)
    """
    M, K = z.shape
    Kw, Np = w_t_padded.shape
    assert K == Kw

    # Ensure >= 2 grid steps whenever M >= 16 so both v7x TensorCores get work;
    # cap at tm to amortize per-step overhead for large batches.
    block_m = min(tm, max(8, _round_up(pl.cdiv(M, 2), 8)))
    grid_m = pl.cdiv(M, block_m)

    cost = pl.CostEstimate(
        flops=2 * M * K * Np,
        transcendentals=0,
        bytes_accessed=(M * K + K * Np + Np) * 4 + M * num_classes * 4,
    )

    return pl.pallas_call(
        _linear_kernel,
        out_shape=jax.ShapeDtypeStruct((M, num_classes), jnp.float32),
        grid_spec=pl.GridSpec(
            grid=(grid_m,),
            in_specs=[
                pl.BlockSpec((block_m, K), lambda i: (i, 0)),   # activations
                pl.BlockSpec((K, Np), lambda i: (0, 0)),        # weight (VMEM-resident)
                pl.BlockSpec((1, Np), lambda i: (0, 0)),        # bias   (VMEM-resident)
            ],
            out_specs=pl.BlockSpec((block_m, num_classes), lambda i: (i, 0)),
        ),
        compiler_params=pltpu.CompilerParams(
            dimension_semantics=("parallel",)),  # batch split across TCs on v7x
        cost_estimate=cost,
    )(z, w_t_padded, bias_padded)


# ----------------------------------------------------------------------------
# Deterministic parameter init (mirrors nn.Linear default U(-1/sqrt(in), ...)).
# Weight is transposed + lane-padded here, ONCE, outside the jitted forward.
# Padded bias columns stay 0: they are sliced off inside the kernel before the
# store, so they never reach the output.
# ----------------------------------------------------------------------------
def init_classifier_params(key, dim=64, num_classes=10):
    k_w, k_b = jax.random.split(key)
    bound = 1.0 / math.sqrt(dim)
    w = jax.random.uniform(k_w, (num_classes, dim), jnp.float32, -bound, bound)
    b = jax.random.uniform(k_b, (num_classes,), jnp.float32, -bound, bound)

    n_pad = _round_up(max(num_classes, 128), 128)
    w_t_padded = jnp.zeros((dim, n_pad), jnp.float32).at[:, :num_classes].set(w.T)
    bias_padded = jnp.zeros((1, n_pad), jnp.float32).at[0, :num_classes].set(b)
    return {
        "w": w,                      # PyTorch layout, kept for reference check
        "b": b,
        "w_t_padded": w_t_padded,    # kernel-ready layout
        "bias_padded": bias_padded,
    }


def classifier_forward(params, z, num_classes):
    return linear_forward(z, params["w_t_padded"], params["bias_padded"],
                          num_classes)


if __name__ == "__main__":
    dim = 64
    num_classes = 10

    key = jax.random.PRNGKey(0)
    k_params, k_z1, k_z2 = jax.random.split(key, 3)
    params = init_classifier_params(k_params, dim, num_classes)

    fwd = jax.jit(functools.partial(classifier_forward, num_classes=num_classes),
                  static_argnames=())

    # Case 1: small aligned batch.
    z1 = jax.random.normal(k_z1, (8, dim), jnp.float32)
    out1 = jax.block_until_ready(fwd(params, z1))
    ref1 = z1 @ params["w"].T + params["b"]
    if not bool(jnp.allclose(out1, ref1, atol=1e-5, rtol=1e-5)):
        raise AssertionError("Pallas linear kernel mismatch (batch=8)")

    # Case 2: ragged batch (exercises cdiv grid + masked last-block writeback,
    # and >=2 grid steps for the v7x parallel split).
    z2 = jax.random.normal(k_z2, (20, dim), jnp.float32)
    out2 = jax.block_until_ready(fwd(params, z2))
    ref2 = z2 @ params["w"].T + params["b"]
    if not bool(jnp.allclose(out2, ref2, atol=1e-5, rtol=1e-5)):
        raise AssertionError("Pallas linear kernel mismatch (batch=20, ragged)")

    print("KERNEL_OK")
</pallas_src>

<mosaic_0001>
module attributes {stable_mosaic.version = 11 : i64} {
  func.func @_linear_kernel(%arg0: i32, %arg1: memref<8x64xf32, #tpu.memory_space<vmem>>, %arg2: memref<64x128xf32, #tpu.memory_space<vmem>>, %arg3: memref<1x128xf32, #tpu.memory_space<vmem>>, %arg4: memref<8x10xf32, #tpu.memory_space<vmem>>) attributes {dimension_semantics = [#tpu.dimension_semantics<parallel>], iteration_bounds = array<i64: 1>, scalar_prefetch = 0 : i64, scratch_operands = 0 : i64, tpu.core_type = #tpu.core_type<tc>, window_params = [{transform_indices = @transform_0, window_bounds = array<i64: 8, 64>}, {pipeline_mode = #tpu.pipeline_mode<synchronous>, transform_indices = @transform_1, window_bounds = array<i64: 64, 128>}, {pipeline_mode = #tpu.pipeline_mode<synchronous>, transform_indices = @transform_2, window_bounds = array<i64: 1, 128>}, {transform_indices = @transform_3, window_bounds = array<i64: 8, 10>}]} {
    %c0 = arith.constant 0 : index
    %c0_0 = arith.constant 0 : index
    %0 = vector.load %arg1[%c0, %c0_0] : memref<8x64xf32, #tpu.memory_space<vmem>>, vector<8x64xf32>
    %c0_1 = arith.constant 0 : index
    %c0_2 = arith.constant 0 : index
    %1 = vector.load %arg2[%c0_1, %c0_2] : memref<64x128xf32, #tpu.memory_space<vmem>>, vector<64x128xf32>
    %cst = arith.constant dense<0.000000e+00> : vector<8x128xf32>
    %2 = tpu.matmul %0, %1, %cst {dimension_numbers = #tpu.dot_dimension_numbers<[1], [0], [0], [1], [0, 0, 1, 1], [], []>} : vector<8x64xf32>, vector<64x128xf32>, vector<8x128xf32> -> vector<8x128xf32>
    %c0_3 = arith.constant 0 : index
    %c0_4 = arith.constant 0 : index
    %3 = vector.load %arg3[%c0_3, %c0_4] : memref<1x128xf32, #tpu.memory_space<vmem>>, vector<1x128xf32>
    %4 = vector.broadcast %3 : vector<1x128xf32> to vector<8x128xf32>
    %5 = arith.addf %2, %4 : vector<8x128xf32>
    %6 = vector.extract_strided_slice %5 {offsets = [0, 0], sizes = [8, 10], strides = [1, 1]} : vector<8x128xf32> to vector<8x10xf32>
    %c0_5 = arith.constant 0 : index
    %c0_6 = arith.constant 0 : index
    %7 = vector.load %arg4[%c0_5, %c0_6] : memref<8x10xf32, #tpu.memory_space<vmem>>, vector<8x10xf32>
    tpu.vector_store %arg4[%c0_5, %c0_6], %6 {strides = array<i32>} : memref<8x10xf32, #tpu.memory_space<vmem>>, vector<8x10xf32>,
    return
  }
  func.func @transform_0(%arg0: i32) -> (i32, i32) {
    %c0_i32 = arith.constant 0 : i32
    %c0_i32_0 = arith.constant 0 : i32
    return %arg0, %c0_i32 : i32, i32
  }
  func.func @transform_1(%arg0: i32) -> (i32, i32) {
    %c0_i32 = arith.constant 0 : i32
    %c0_i32_0 = arith.constant 0 : i32
    %c0_i32_1 = arith.constant 0 : i32
    return %c0_i32, %c0_i32_0 : i32, i32
  }
  func.func @transform_2(%arg0: i32) -> (i32, i32) {
    %c0_i32 = arith.constant 0 : i32
    %c0_i32_0 = arith.constant 0 : i32
    %c0_i32_1 = arith.constant 0 : i32
    return %c0_i32, %c0_i32_0 : i32, i32
  }
  func.func @transform_3(%arg0: i32) -> (i32, i32) {
    %c0_i32 = arith.constant 0 : i32
    %c0_i32_0 = arith.constant 0 : i32
    return %arg0, %c0_i32 : i32, i32
  }
}

</mosaic_0001>

<bundles_post_ra>
// kernel: classifier_forward.1
= control target key start
LH: loop header
LB: loop body
LE: loop exit
PB: predicated region body
PF: predicated region fallthrough
CT: control target
= control target key end

     0   :  { %8 = vsyncpa [#allocation3], 0  ;;  %s324_s0 = inlined_call_operand.hbm [shape: f32[8,64], index: 0, kind: input, shape index: {}]   ;;  %s325_s1 = inlined_call_operand.hbm [shape: f32[64,128], index: 1, kind: input, shape index: {}]   ;;  %s326_s2 = inlined_call_operand.hbm [shape: f32[1,128], index: 2, kind: input, shape index: {}]   ;;  %s327_s3 = inlined_call_operand.hbm [shape: f32[8,10], index: 3, kind: output, shape index: {}]  }
   0x1   :  { %9 = vsyncpa [#allocation6], 0 }
   0x2   :  { %10 = vsyncpa [#allocation4], 0  ;;  %s284_s12 = smov [#allocation5]  }
   0x3   :  { %s26_s13 = sshll.u32 %s284_s12, 4  ;;  %s27_s13 = int_to_ptr.vmem [resolvable:$true] %s26_s13 }
   0x4   :  { %s206_s14 = scalar_lea.vmem %s27_s13, 1024  ;;  %p211_p1 = scmp.lt.s32.totalorder %s27_s13, %s27_s13 }
   0x5   :  { %p207_p0 = scmp.ne.s32.totalorder %s27_s13, %s206_s14  ;;  %p212_p2 = scmp.lt.s32.totalorder %s206_s14, %s206_s14 }
   0x7   :  { %p213_p3 = por %p212_p2, %p211_p1 }
   0x9   :  { %p214_p4 = pnand %p213_p3, %p207_p0 }
   0xb   :  { %217 = shalt.err (!%p214_p4)
}
   0xc   :  { %s285_s15 = smov 128   ;;  %s286_s16 = smov 8  }
   0xd   :  { %32 = dma.hbm_to_vmem [thread:$0]  %s325_s1, 1024, %s27_s13, [#allocation6], %s285_s15, %s285_s15, %s286_s16  }
   0xe   :  { %s287_s19 = smov [#allocation2]   ;;  %s288_s21 = smov [#allocation7]  }
   0xf   :  { %s17_s20 = sshll.u32 %s287_s19, 4  ;;  %s39_s22 = sshll.u32 %s288_s21, 4  ;;  %s18_s20 = int_to_ptr.vmem [resolvable:$true] %s17_s20  ;;  %s40_s22 = int_to_ptr.vmem [resolvable:$true] %s39_s22 }
  0x10   :  { %s226_s23 = scalar_lea.vmem %s18_s20, 128  ;;  %p231_p6 = scmp.lt.s32.totalorder %s18_s20, %s18_s20 }
  0x11   :  { %p227_p5 = scmp.ne.s32.totalorder %s18_s20, %s226_s23  ;;  %p232_p7 = scmp.lt.s32.totalorder %s226_s23, %s226_s23 }
  0x13   :  { %p233_p8 = por %p232_p7, %p231_p6 }
  0x15   :  { %p234_p9 = pnand %p233_p8, %p227_p5 }
  0x17   :  { %237 = shalt.err (!%p234_p9)
}
  0x18   :  { %20 = dma.hbm_to_vmem [thread:$0]  %s324_s0, 128, %s18_s20, [#allocation3]  }
  0x19   :  { %s246_s26 = scalar_lea.vmem %s40_s22, 16  ;;  %s250_s1 = scalar_lea.vmem %s40_s22, 32 }
  0x1a   :  { %p247_p10 = scmp.ne.s32.totalorder %s40_s22, %s246_s26  ;;  %p251_p11 = scmp.lt.s32.totalorder %s40_s22, %s40_s22 }
  0x1b   :  { %p252_p12 = scmp.lt.s32.totalorder %s250_s1, %s246_s26 }
  0x1d   :  { %p253_p13 = por %p252_p12, %p251_p11 }
  0x1f   :  { %p254_p0 = pnand %p253_p13, %p247_p10 }
  0x21   :  { %257 = shalt.err (!%p254_p0)
}
  0x22   :  { %42 = dma.hbm_to_vmem [thread:$0]  %s326_s2, 16, %s40_s22, [#allocation6]  }
  0x23   :  { %278 = dma.done.wait [#allocation3], 128  }
  0x24   :  { %279 = vsyncadd [#allocation3], 4294967168 }
  0x25   :  { %280 = dma.done.wait [#allocation6], 1040  }
  0x26   :  { %281 = vsyncadd [#allocation6], 4294966256  ;;  %v289_v0 = vmov 0.0   ;;  %vm290_vm0 = vmmov 0   ;;  %v60_v1 = vld [vmem:[#allocation5 + $0x38] sm:$0xff]  ;;  %v59_v2 = vld [vmem:[#allocation5 + $0x30] sm:$0xff] }
  0x27   :  { %171 = vmatprep.subr.mxu0 %v289_v0  ;;  %187 = vmatprep.mubr.msk.f32.mxu0 %vm290_vm0, %v289_v0  ;;  %v58_v3 = vld [vmem:[#allocation5 + $0x28] sm:$0xff]  ;;  %v57_v4 = vld [vmem:[#allocation5 + $0x20] sm:$0xff]  ;;  %v56_v5 = vld [vmem:[#allocation5 + $0x18] sm:$0xff]  ;;  %vm68_vm1 = vcmask 523264   ;;  %s291_s0 = smov [#allocation8]   ;;  %vm142_vm2 = vcmask 80896  }
  0x28   :  { %172 = vmatpush3.msra.mxu0 %v60_v1  ;;  %v55_v6 = vld [vmem:[#allocation5 + $0x10] sm:$0xff]  ;;  %v54_v7 = vld [vmem:[#allocation5 + $0x8] sm:$0xff]  ;;  %v53_v8 = vld [vmem:[#allocation5] sm:$0xff]  ;;  %s150_s2 = sshll.u32 %s291_s0, 4  ;;  %s151_s2 = int_to_ptr.vmem [resolvable:$true] %s150_s2 }
  0x29   :  { %173 = vmatprep.subr.mxu0 %v289_v0  ;;  %v52_v9 = vld [vmem:[#allocation2] sm:$0xff]  ;;  %v160_v10 = vld [vmem:[#allocation7] ss:$0 sm:$0xff]  ;;  %s258_s29 = scalar_lea.vmem %s151_s2, 128  ;;  %p263_p2 = scmp.lt.s32.totalorder %s151_s2, %s151_s2 }
  0x2a   :  { %174 = vmatpush3.msra.mxu0 %v59_v2  ;;  %p259_p1 = scmp.ne.s32.totalorder %s151_s2, %s258_s29  ;;  %p264_p3 = scmp.lt.s32.totalorder %s258_s29, %s258_s29 }
  0x2b   :  { %175 = vmatprep.subr.mxu0 %v289_v0 }
  0x2c   :  { %176 = vmatpush3.msra.mxu0 %v58_v3  ;;  %p265_p4 = por %p264_p3, %p263_p2 }
  0x2d   :  { %177 = vmatprep.subr.mxu0 %v289_v0 }
  0x2e   :  { %178 = vmatpush3.msra.mxu0 %v57_v4  ;;  %p266_p5 = pnand %p265_p4, %p259_p1 }
  0x2f   :  { %179 = vmatprep.subr.mxu0 %v289_v0 }
  0x30   :  { %180 = vmatpush3.msra.mxu0 %v56_v5 }
  0x31   :  { %181 = vmatprep.subr.mxu0 %v289_v0 }
  0x32   :  { %182 = vmatpush3.msra.mxu0 %v55_v6 }
  0x33   :  { %183 = vmatprep.subr.mxu0 %v289_v0 }
  0x34   :  { %184 = vmatpush3.msra.mxu0 %v54_v7 }
  0x35   :  { %185 = vmatprep.subr.mxu0 %v289_v0 }
  0x36   :  { %186 = vmatpush3.msra.mxu0 %v53_v8 }
  0x37   :  { %188 = vmatmul.mubr.msk.f32.vlgmr.msra.gmra.mxu0 %vm68_vm1, %v52_v9 }
  0xf7   :  { %v138_v11 = vpop.f32.mrf.mxu0 }
  0xf8   :  { %v139_v12 = vadd.f32 %v160_v10, %v138_v11 }
  0xf9   :  { %v189_v13 = vpop.f32.mrf.mxu0 }
  0xfa   :  { %143 = vst.msk [vmem:[#allocation8] sm:$0xff] %vm142_vm2, %v139_v12 }
  0xfb   :  { %269 = shalt.err (!%p266_p5)
}
  0xfc   :  { %153 = dma.vmem_to_hbm [thread:$0]  %s151_s2, 128, %s327_s3, [#allocation4]  }
  0xfd   :  { %282 = dma.done.wait [#allocation4], 128  }
  0xfe   :  { %283 = vsyncadd [#allocation4], 4294967168 }
  0xff   :  { %157 = vsyncpa [#allocation3], 1 }
 0x100   :  { %158 = vsyncpa [#allocation6], 1 }
 0x101   :  { %159 = vsyncpa [#allocation4], 1 }

</bundles_post_ra>
